<compile_context>
chip_gen: v7x
topology: tpu7x:2x2x1
jax: 0.10.0
libtpu: 0.0.40
codegen_flags: <defaults>
</compile_context>

<pallas_src>
import jax
import jax.numpy as jnp
from jax.experimental import pallas as pl
from jax.experimental.pallas import tpu as pltpu

F_IN = 17 * 3       # flattened input feature width (x.view(-1, 17, 3, 1))
F_IN_PAD = 64       # padded input feature width (aligned rows; 64 == full dim OK)
FC1_OUT = 256       # fc1 output width (fixed by the module)
N_OUT = 3           # fc2 output width
OUT_PAD = 128       # padded fc2 output width (lane-dense, unmasked stores)
LANE = 128


def _round_up(n, m):
    return ((n + m - 1) // m) * m


# ---------------------------------------------------------------------------
# Pallas kernel: full 5-layer forward on one tall batch tile.
# ---------------------------------------------------------------------------
def cnnsingle_kernel(x_ref, w1_ref, w23_ref, wf1_ref, wf2_ref,
                     bconv_ref, bfc1_ref, bfc2_ref, out_ref):
    cdt = w1_ref.dtype                                    # compute dtype (bf16 or f32)
    # conv1 as banded matmul: (tb, 64) @ (64, HP) + bias + ReLU
    h = jnp.dot(x_ref[...], w1_ref[...],
                preferred_element_type=jnp.float32) + bconv_ref[0]
    h = jnp.maximum(h, 0.0)
    # conv2 / conv3: (tb, HP) @ (HP, HP) + bias + ReLU (padded cols stay 0)
    for l in range(2):
        h = jnp.dot(h.astype(cdt), w23_ref[l],
                    preferred_element_type=jnp.float32) + bconv_ref[l + 1]
        h = jnp.maximum(h, 0.0)
    # fc1: (tb, HP) @ (HP, 256) + bias + ReLU
    h = jnp.dot(h.astype(cdt), wf1_ref[...],
                preferred_element_type=jnp.float32) + bfc1_ref[...]
    h = jnp.maximum(h, 0.0)
    # fc2: (tb, 256) @ (256, 128); padded output columns remain exactly 0
    out_ref[...] = jnp.dot(h.astype(cdt), wf2_ref[...],
                           preferred_element_type=jnp.float32) + bfc2_ref[...]


def cnnsingle_forward(x, packed, *, tb=1024, min_steps=1):
    """x: (B, 51) f32.  packed: output of pack_params (weights already in
    compute dtype, biases f32).  min_steps>1 forces that many batch tiles so
    v7x's two TensorCores both get work (no-op on single-TC v5e/v6e)."""
    W1p, W23, Wf1p, Wf2p, bconv, bfc1, bfc2 = packed
    B, F = x.shape
    assert F == F_IN
    cdt = W1p.dtype
    f_pad = W1p.shape[0]
    hp = W1p.shape[1]
    out_pad = Wf2p.shape[1]

    tb_eff = min(int(tb), _round_up(B, 8))                # tall tile, multiple of 8
    if min_steps > 1:
        tb_eff = min(tb_eff, max(8, _round_up(pl.cdiv(B, min_steps), 8)))
    b_pad = _round_up(B, tb_eff)

    # zero-pad batch + feature dims; cast activations to the compute dtype once
    xp = jnp.zeros((b_pad, f_pad), cdt).at[:B, :F].set(x.astype(cdt))

    grid_spec = pltpu.PrefetchScalarGridSpec(
        num_scalar_prefetch=0,
        grid=(b_pad // tb_eff,),
        in_specs=[
            pl.BlockSpec((tb_eff, f_pad), lambda i: (i, 0)),
            # grid-invariant operands: constant index_map -> no re-DMA across steps
            pl.BlockSpec(W1p.shape, lambda i: (0, 0)),
            pl.BlockSpec(W23.shape, lambda i: (0, 0, 0)),
            pl.BlockSpec(Wf1p.shape, lambda i: (0, 0)),
            pl.BlockSpec(Wf2p.shape, lambda i: (0, 0)),
            pl.BlockSpec(bconv.shape, lambda i: (0, 0, 0)),
            pl.BlockSpec(bfc1.shape, lambda i: (0, 0)),
            pl.BlockSpec(bfc2.shape, lambda i: (0, 0)),
        ],
        out_specs=pl.BlockSpec((tb_eff, out_pad), lambda i: (i, 0)),
    )
    out = pl.pallas_call(
        cnnsingle_kernel,
        out_shape=jax.ShapeDtypeStruct((b_pad, out_pad), jnp.float32),
        grid_spec=grid_spec,
        compiler_params=pltpu.CompilerParams(
            dimension_semantics=("parallel",)),
    )(xp, W1p, W23, Wf1p, Wf2p, bconv, bfc1, bfc2)
    return out[:B, :N_OUT]


# ---------------------------------------------------------------------------
# Glue: lower each 3x3 conv (on 3x1 spatial input, padding (1,1)) to a banded
# matmul, pad each layer only to the width it needs, hoist dtype casts.
# ---------------------------------------------------------------------------
def conv_as_matmul(w, b):
    """w: (cout, cin, 3, 3), b: (cout,) -> W_eff (cin*3, cout*3), b_eff (cout*3,).

    Spatial width is 1, so only kernel column kw=1 sees valid input.
    W_eff[ci*3 + hi, co*3 + ho] = w[co, ci, hi - ho + 1, 1] for |hi - ho| <= 1.
    """
    cout, cin = w.shape[0], w.shape[1]
    wm = w[:, :, :, 1]                                    # (cout, cin, kh)
    hi = jnp.arange(3)[:, None, None]
    ho = jnp.arange(3)[None, :, None]
    kh = jnp.arange(3)[None, None, :]
    band = (kh == (hi - ho + 1)).astype(w.dtype)          # (hi, ho, kh)
    W4 = jnp.einsum("ock,hgk->chog", wm, band)            # (cin, hi, cout, ho)
    W_eff = W4.reshape(cin * 3, cout * 3)
    b_eff = jnp.repeat(b, 3)
    return W_eff, b_eff


def pack_params(params, compute_dtype=jnp.bfloat16):
    """Consolidate layer params into per-layer-padded, lane-dense operands.
    Weights are stored once in compute_dtype; biases stay f32."""
    (c1w, c1b, c2w, c2b, c3w, c3b, f1w, f1b, f2w, f2b) = params
    W1, bb1 = conv_as_matmul(c1w, c1b)                    # (51, c1*3)
    W2, bb2 = conv_as_matmul(c2w, c2b)                    # (c1*3, c2*3)
    W3, bb3 = conv_as_matmul(c3w, c3b)                    # (c2*3, c3*3)
    hp = _round_up(max(W1.shape[1], W2.shape[1], W3.shape[1]), LANE)  # 128 for <=42 ch

    def pad_w(w, rows, cols):
        return jnp.zeros((rows, cols), jnp.float32).at[:w.shape[0], :w.shape[1]].set(w)

    def pad_b(b, cols):
        b = b.reshape(-1).astype(jnp.float32)
        return jnp.zeros((cols,), jnp.float32).at[:b.shape[0]].set(b)

    W1p = pad_w(W1, F_IN_PAD, hp).astype(compute_dtype)              # (64, 128)
    W23 = jnp.stack([pad_w(W2, hp, hp),
                     pad_w(W3, hp, hp)]).astype(compute_dtype)       # (2, 128, 128)
    Wf1p = pad_w(f1w.T, hp, FC1_OUT).astype(compute_dtype)           # (128, 256)
    Wf2p = pad_w(f2w.T, FC1_OUT, OUT_PAD).astype(compute_dtype)      # (256, 128)
    bconv = jnp.stack([pad_b(bb1, hp), pad_b(bb2, hp),
                       pad_b(bb3, hp)]).reshape(3, 1, hp)            # (3, 1, 128) f32
    bfc1 = pad_b(f1b, FC1_OUT).reshape(1, FC1_OUT)                   # (1, 256) f32
    bfc2 = pad_b(f2b, OUT_PAD).reshape(1, OUT_PAD)                   # (1, 128) f32
    return W1p, W23, Wf1p, Wf2p, bconv, bfc1, bfc2


# ---------------------------------------------------------------------------
# Pure-JAX reference (mirrors the PyTorch forward exactly).
# ---------------------------------------------------------------------------
def reference_forward(x, params, c3):
    (c1w, c1b, c2w, c2b, c3w, c3b, f1w, f1b, f2w, f2b) = params

    def conv(h, w, b):
        y = jax.lax.conv_general_dilated(
            h, w, window_strides=(1, 1), padding=[(1, 1), (1, 1)],
            dimension_numbers=("NCHW", "OIHW", "NCHW"))
        return y + b[None, :, None, None]

    h = x.reshape(-1, 17, 3, 1)
    h = jax.nn.relu(conv(h, c1w, c1b))
    h = jax.nn.relu(conv(h, c2w, c2b))
    h = jax.nn.relu(conv(h, c3w, c3b))
    h = h.reshape(-1, c3 * 3)
    h = jax.nn.relu(h @ f1w.T + f1b)
    return h @ f2w.T + f2b


def uniform_init(key, shape, fan_in):
    bound = 1.0 / jnp.sqrt(jnp.float32(fan_in))
    return jax.random.uniform(key, shape, jnp.float32, -bound, bound)


if __name__ == "__main__":
    conv1_channels, conv2_channels, conv3_channels = 8, 8, 8
    B = 16

    key = jax.random.PRNGKey(0)
    ks = jax.random.split(key, 12)

    # Input: the module does x.view(-1, 17, 3, 1) -> flat feature dim is 51.
    x = jax.random.normal(ks[0], (B, F_IN), jnp.float32)

    # Deterministic PyTorch-style uniform(-1/sqrt(fan_in), 1/sqrt(fan_in)) init.
    c1w = uniform_init(ks[1], (conv1_channels, 17, 3, 3), 17 * 9)
    c1b = uniform_init(ks[2], (conv1_channels,), 17 * 9)
    c2w = uniform_init(ks[3], (conv2_channels, conv1_channels, 3, 3), conv1_channels * 9)
    c2b = uniform_init(ks[4], (conv2_channels,), conv1_channels * 9)
    c3w = uniform_init(ks[5], (conv3_channels, conv2_channels, 3, 3), conv2_channels * 9)
    c3b = uniform_init(ks[6], (conv3_channels,), conv2_channels * 9)
    f1w = uniform_init(ks[7], (FC1_OUT, conv3_channels * 3), conv3_channels * 3)
    f1b = uniform_init(ks[8], (FC1_OUT,), conv3_channels * 3)
    f2w = uniform_init(ks[9], (N_OUT, FC1_OUT), FC1_OUT)
    f2b = uniform_init(ks[10], (N_OUT,), FC1_OUT)

    params = (c1w, c1b, c2w, c2b, c3w, c3b, f1w, f1b, f2w, f2b)
    ref = jax.block_until_ready(reference_forward(x, params, conv3_channels))

    # Default bf16-MXU path (weights/activations bf16, f32 accumulation).
    packed_bf16 = pack_params(params, compute_dtype=jnp.bfloat16)
    out_bf16 = jax.block_until_ready(cnnsingle_forward(x, packed_bf16, tb=1024))
    assert out_bf16.shape == (B, N_OUT)
    assert jnp.allclose(out_bf16, ref, rtol=5e-2, atol=5e-2), "bf16 mismatch vs reference"

    # f32 path: tight numerical check against the reference.
    packed_f32 = pack_params(params, compute_dtype=jnp.float32)
    out_f32 = jax.block_until_ready(cnnsingle_forward(x, packed_f32, tb=1024))
    assert out_f32.shape == (B, N_OUT)
    assert jnp.allclose(out_f32, ref, rtol=1e-4, atol=1e-5), "f32 mismatch vs reference"

    print("KERNEL_OK")
</pallas_src>

<mosaic_0001>
module attributes {stable_mosaic.version = 11 : i64} {
  func.func @cnnsingle_kernel(%arg0: i32, %arg1: memref<16x64xbf16, #tpu.memory_space<vmem>>, %arg2: memref<64x128xbf16, #tpu.memory_space<vmem>>, %arg3: memref<2x128x128xbf16, #tpu.memory_space<vmem>>, %arg4: memref<128x256xbf16, #tpu.memory_space<vmem>>, %arg5: memref<256x128xbf16, #tpu.memory_space<vmem>>, %arg6: memref<3x1x128xf32, #tpu.memory_space<vmem>>, %arg7: memref<1x256xf32, #tpu.memory_space<vmem>>, %arg8: memref<1x128xf32, #tpu.memory_space<vmem>>, %arg9: memref<16x128xf32, #tpu.memory_space<vmem>>) attributes {dimension_semantics = [#tpu.dimension_semantics<parallel>], iteration_bounds = array<i64: 1>, scalar_prefetch = 0 : i64, scratch_operands = 0 : i64, tpu.core_type = #tpu.core_type<tc>, window_params = [{transform_indices = @transform_0, window_bounds = array<i64: 16, 64>}, {pipeline_mode = #tpu.pipeline_mode<synchronous>, transform_indices = @transform_1, window_bounds = array<i64: 64, 128>}, {pipeline_mode = #tpu.pipeline_mode<synchronous>, transform_indices = @transform_2, window_bounds = array<i64: 2, 128, 128>}, {pipeline_mode = #tpu.pipeline_mode<synchronous>, transform_indices = @transform_3, window_bounds = array<i64: 128, 256>}, {pipeline_mode = #tpu.pipeline_mode<synchronous>, transform_indices = @transform_4, window_bounds = array<i64: 256, 128>}, {pipeline_mode = #tpu.pipeline_mode<synchronous>, transform_indices = @transform_5, window_bounds = array<i64: 3, 1, 128>}, {pipeline_mode = #tpu.pipeline_mode<synchronous>, transform_indices = @transform_6, window_bounds = array<i64: 1, 256>}, {pipeline_mode = #tpu.pipeline_mode<synchronous>, transform_indices = @transform_7, window_bounds = array<i64: 1, 128>}, {transform_indices = @transform_8, window_bounds = array<i64: 16, 128>}]} {
    %c0 = arith.constant 0 : index
    %c0_0 = arith.constant 0 : index
    %0 = vector.load %arg1[%c0, %c0_0] : memref<16x64xbf16, #tpu.memory_space<vmem>>, vector<16x64xbf16>
    %c0_1 = arith.constant 0 : index
    %c0_2 = arith.constant 0 : index
    %1 = vector.load %arg2[%c0_1, %c0_2] : memref<64x128xbf16, #tpu.memory_space<vmem>>, vector<64x128xbf16>
    %cst = arith.constant dense<0.000000e+00> : vector<16x128xf32>
    %2 = tpu.matmul %0, %1, %cst {dimension_numbers = #tpu.dot_dimension_numbers<[1], [0], [0], [1], [0, 0, 1, 1], [], []>} : vector<16x64xbf16>, vector<64x128xbf16>, vector<16x128xf32> -> vector<16x128xf32>
    %c0_3 = arith.constant 0 : index
    %c0_4 = arith.constant 0 : index
    %c0_5 = arith.constant 0 : index
    %3 = vector.load %arg6[%c0_3, %c0_4, %c0_5] : memref<3x1x128xf32, #tpu.memory_space<vmem>>, vector<1x1x128xf32>
    %4 = vector.shape_cast %3 : vector<1x1x128xf32> to vector<1x128xf32>
    %5 = vector.broadcast %4 : vector<1x128xf32> to vector<16x128xf32>
    %6 = arith.addf %2, %5 : vector<16x128xf32>
    %cst_6 = arith.constant 0.000000e+00 : f32
    %7 = vector.broadcast %cst_6 : f32 to vector<16x128xf32>
    %8 = arith.maximumf %6, %7 : vector<16x128xf32>
    %9 = arith.truncf %8 : vector<16x128xf32> to vector<16x128xbf16>
    %c0_7 = arith.constant 0 : index
    %c0_8 = arith.constant 0 : index
    %c0_9 = arith.constant 0 : index
    %10 = vector.load %arg3[%c0_7, %c0_8, %c0_9] : memref<2x128x128xbf16, #tpu.memory_space<vmem>>, vector<1x128x128xbf16>
    %11 = vector.shape_cast %10 : vector<1x128x128xbf16> to vector<128x128xbf16>
    %cst_10 = arith.constant dense<0.000000e+00> : vector<16x128xf32>
    %12 = tpu.matmul %9, %11, %cst_10 {dimension_numbers = #tpu.dot_dimension_numbers<[1], [0], [0], [1], [0, 0, 1, 1], [], []>} : vector<16x128xbf16>, vector<128x128xbf16>, vector<16x128xf32> -> vector<16x128xf32>
    %c1 = arith.constant 1 : index
    %c0_11 = arith.constant 0 : index
    %c0_12 = arith.constant 0 : index
    %13 = vector.load %arg6[%c1, %c0_11, %c0_12] : memref<3x1x128xf32, #tpu.memory_space<vmem>>, vector<1x1x128xf32>
    %14 = vector.shape_cast %13 : vector<1x1x128xf32> to vector<1x128xf32>
    %15 = vector.broadcast %14 : vector<1x128xf32> to vector<16x128xf32>
    %16 = arith.addf %12, %15 : vector<16x128xf32>
    %cst_13 = arith.constant 0.000000e+00 : f32
    %17 = vector.broadcast %cst_13 : f32 to vector<16x128xf32>
    %18 = arith.maximumf %16, %17 : vector<16x128xf32>
    %19 = arith.truncf %18 : vector<16x128xf32> to vector<16x128xbf16>
    %c1_14 = arith.constant 1 : index
    %c0_15 = arith.constant 0 : index
    %c0_16 = arith.constant 0 : index
    %20 = vector.load %arg3[%c1_14, %c0_15, %c0_16] : memref<2x128x128xbf16, #tpu.memory_space<vmem>>, vector<1x128x128xbf16>
    %21 = vector.shape_cast %20 : vector<1x128x128xbf16> to vector<128x128xbf16>
    %cst_17 = arith.constant dense<0.000000e+00> : vector<16x128xf32>
    %22 = tpu.matmul %19, %21, %cst_17 {dimension_numbers = #tpu.dot_dimension_numbers<[1], [0], [0], [1], [0, 0, 1, 1], [], []>} : vector<16x128xbf16>, vector<128x128xbf16>, vector<16x128xf32> -> vector<16x128xf32>
    %c2 = arith.constant 2 : index
    %c0_18 = arith.constant 0 : index
    %c0_19 = arith.constant 0 : index
    %23 = vector.load %arg6[%c2, %c0_18, %c0_19] : memref<3x1x128xf32, #tpu.memory_space<vmem>>, vector<1x1x128xf32>
    %24 = vector.shape_cast %23 : vector<1x1x128xf32> to vector<1x128xf32>
    %25 = vector.broadcast %24 : vector<1x128xf32> to vector<16x128xf32>
    %26 = arith.addf %22, %25 : vector<16x128xf32>
    %cst_20 = arith.constant 0.000000e+00 : f32
    %27 = vector.broadcast %cst_20 : f32 to vector<16x128xf32>
    %28 = arith.maximumf %26, %27 : vector<16x128xf32>
    %29 = arith.truncf %28 : vector<16x128xf32> to vector<16x128xbf16>
    %c0_21 = arith.constant 0 : index
    %c0_22 = arith.constant 0 : index
    %30 = vector.load %arg4[%c0_21, %c0_22] : memref<128x256xbf16, #tpu.memory_space<vmem>>, vector<128x256xbf16>
    %cst_23 = arith.constant dense<0.000000e+00> : vector<16x256xf32>
    %31 = tpu.matmul %29, %30, %cst_23 {dimension_numbers = #tpu.dot_dimension_numbers<[1], [0], [0], [1], [0, 0, 1, 1], [], []>} : vector<16x128xbf16>, vector<128x256xbf16>, vector<16x256xf32> -> vector<16x256xf32>
    %c0_24 = arith.constant 0 : index
    %c0_25 = arith.constant 0 : index
    %32 = vector.load %arg7[%c0_24, %c0_25] : memref<1x256xf32, #tpu.memory_space<vmem>>, vector<1x256xf32>
    %33 = vector.broadcast %32 : vector<1x256xf32> to vector<16x256xf32>
    %34 = arith.addf %31, %33 : vector<16x256xf32>
    %cst_26 = arith.constant 0.000000e+00 : f32
    %35 = vector.broadcast %cst_26 : f32 to vector<16x256xf32>
    %36 = arith.maximumf %34, %35 : vector<16x256xf32>
    %37 = arith.truncf %36 : vector<16x256xf32> to vector<16x256xbf16>
    %c0_27 = arith.constant 0 : index
    %c0_28 = arith.constant 0 : index
    %38 = vector.load %arg5[%c0_27, %c0_28] : memref<256x128xbf16, #tpu.memory_space<vmem>>, vector<256x128xbf16>
    %cst_29 = arith.constant dense<0.000000e+00> : vector<16x128xf32>
    %39 = tpu.matmul %37, %38, %cst_29 {dimension_numbers = #tpu.dot_dimension_numbers<[1], [0], [0], [1], [0, 0, 1, 1], [], []>} : vector<16x256xbf16>, vector<256x128xbf16>, vector<16x128xf32> -> vector<16x128xf32>
    %c0_30 = arith.constant 0 : index
    %c0_31 = arith.constant 0 : index
    %40 = vector.load %arg8[%c0_30, %c0_31] : memref<1x128xf32, #tpu.memory_space<vmem>>, vector<1x128xf32>
    %41 = vector.broadcast %40 : vector<1x128xf32> to vector<16x128xf32>
    %42 = arith.addf %39, %41 : vector<16x128xf32>
    %c0_32 = arith.constant 0 : index
    %c0_33 = arith.constant 0 : index
    %43 = vector.load %arg9[%c0_32, %c0_33] : memref<16x128xf32, #tpu.memory_space<vmem>>, vector<16x128xf32>
    tpu.vector_store %arg9[%c0_32, %c0_33], %42 {strides = array<i32>} : memref<16x128xf32, #tpu.memory_space<vmem>>, vector<16x128xf32>,
    return
  }
  func.func @transform_0(%arg0: i32) -> (i32, i32) {
    %c0_i32 = arith.constant 0 : i32
    %c0_i32_0 = arith.constant 0 : i32
    return %arg0, %c0_i32 : i32, i32
  }
  func.func @transform_1(%arg0: i32) -> (i32, i32) {
    %c0_i32 = arith.constant 0 : i32
    %c0_i32_0 = arith.constant 0 : i32
    %c0_i32_1 = arith.constant 0 : i32
    return %c0_i32, %c0_i32_0 : i32, i32
  }
  func.func @transform_2(%arg0: i32) -> (i32, i32, i32) {
    %c0_i32 = arith.constant 0 : i32
    %c0_i32_0 = arith.constant 0 : i32
    %c0_i32_1 = arith.constant 0 : i32
    %c0_i32_2 = arith.constant 0 : i32
    return %c0_i32, %c0_i32_0, %c0_i32_1 : i32, i32, i32
  }
  func.func @transform_3(%arg0: i32) -> (i32, i32) {
    %c0_i32 = arith.constant 0 : i32
    %c0_i32_0 = arith.constant 0 : i32
    %c0_i32_1 = arith.constant 0 : i32
    return %c0_i32, %c0_i32_0 : i32, i32
  }
  func.func @transform_4(%arg0: i32) -> (i32, i32) {
    %c0_i32 = arith.constant 0 : i32
    %c0_i32_0 = arith.constant 0 : i32
    %c0_i32_1 = arith.constant 0 : i32
    return %c0_i32, %c0_i32_0 : i32, i32
  }
  func.func @transform_5(%arg0: i32) -> (i32, i32, i32) {
    %c0_i32 = arith.constant 0 : i32
    %c0_i32_0 = arith.constant 0 : i32
    %c0_i32_1 = arith.constant 0 : i32
    %c0_i32_2 = arith.constant 0 : i32
    return %c0_i32, %c0_i32_0, %c0_i32_1 : i32, i32, i32
  }
  func.func @transform_6(%arg0: i32) -> (i32, i32) {
    %c0_i32 = arith.constant 0 : i32
    %c0_i32_0 = arith.constant 0 : i32
    %c0_i32_1 = arith.constant 0 : i32
    return %c0_i32, %c0_i32_0 : i32, i32
  }
  func.func @transform_7(%arg0: i32) -> (i32, i32) {
    %c0_i32 = arith.constant 0 : i32
    %c0_i32_0 = arith.constant 0 : i32
    %c0_i32_1 = arith.constant 0 : i32
    return %c0_i32, %c0_i32_0 : i32, i32
  }
  func.func @transform_8(%arg0: i32) -> (i32, i32) {
    %c0_i32 = arith.constant 0 : i32
    %c0_i32_0 = arith.constant 0 : i32
    return %arg0, %c0_i32 : i32, i32
  }
}

</mosaic_0001>

<bundles_post_ra>
// kernel: tpu_custom_call.1
= control target key start
LH: loop header
LB: loop body
LE: loop exit
PB: predicated region body
PF: predicated region fallthrough
CT: control target
= control target key end

     0   :  { %13 = vsyncpa [#allocation3], 0  ;;  %s1354_s0 = inlined_call_operand.hbm [shape: bf16[16,64], index: 0, kind: input, shape index: {}]   ;;  %s1355_s1 = inlined_call_operand.hbm [shape: bf16[64,128], index: 1, kind: input, shape index: {}]   ;;  %s1356_s2 = inlined_call_operand.hbm [shape: bf16[2,128,128], index: 2, kind: input, shape index: {}]   ;;  %s1357_s3 = inlined_call_operand.hbm [shape: bf16[128,256], index: 3, kind: input, shape index: {}]   ;;  %s1358_s4 = inlined_call_operand.hbm [shape: bf16[256,128], index: 4, kind: input, shape index: {}]   ;;  %s1359_s5 = inlined_call_operand.vmem [shape: f32[3,1,128], index: 5, kind: input, shape index: {}]   ;;  %s1360_s6 = inlined_call_operand.vmem [shape: f32[1,256], index: 6, kind: input, shape index: {}]   ;;  %s1361_s7 = inlined_call_operand.vmem [shape: f32[1,128], index: 7, kind: input, shape index: {}]   ;;  %s1362_s8 = inlined_call_operand.hbm [shape: f32[16,128], index: 8, kind: output, shape index: {}]  }
   0x1   :  { %14 = vsyncpa [#allocation6], 0 }
   0x2   :  { %15 = vsyncpa [#allocation9], 0 }
   0x3   :  { %16 = vsyncpa [#allocation4], 0  ;;  %s1151_s27 = smov [#allocation5]   ;;  %s1152_s29 = smov [#allocation8]  }
   0x4   :  { %s34_s28 = sshll.u32 %s1151_s27, 4  ;;  %s58_s30 = sshll.u32 %s1152_s29, 4  ;;  %s35_s28 = int_to_ptr.vmem [resolvable:$true] %s34_s28  ;;  %s1209_s30 = int_to_ptr.vmem [resolvable:$true] %s58_s30 }
   0x5   :  { %s1011_s11 = scalar_lea.hbm %s1355_s1, 512 }
   0x6   :  { %p1012_p0 = scmp.ne.s32.totalorder %s1355_s1, %s1011_s11  ;;  %p1015_p1 = scmp.lt.u32.totalorder %s1011_s11, %s1355_s1 }
   0x8   :  { %p1017_p2 = pnand %p1015_p1, %p1012_p0 }
   0xa   :  { %1020 = shalt.err (!%p1017_p2)
}
   0xb   :  { %s1021_s16 = scalar_lea.vmem %s35_s28, 512  ;;  %p1026_p4 = scmp.lt.s32.totalorder %s35_s28, %s35_s28 }
   0xc   :  { %p1022_p3 = scmp.ne.s32.totalorder %s35_s28, %s1021_s16  ;;  %p1027_p5 = scmp.lt.s32.totalorder %s1021_s16, %s1021_s16 }
   0xe   :  { %p1028_p6 = por %p1027_p5, %p1026_p4 }
  0x10   :  { %p1029_p7 = pnand %p1028_p6, %p1022_p3 }
  0x12   :  { %1032 = shalt.err (!%p1029_p7)
}
  0x13   :  { %s1153_s17 = smov 64   ;;  %s1154_s18 = smov 4  }
  0x14   :  { %40 = dma.hbm_to_vmem [thread:$0]  %s1355_s1, 512, %s35_s28, [#allocation6], %s1153_s17, %s1153_s17, %s1154_s18  }
  0x15   :  { %s1033_s23 = scalar_lea.hbm %s1357_s3, 2048 }
  0x16   :  { %p1034_p8 = scmp.ne.s32.totalorder %s1357_s3, %s1033_s23  ;;  %p1037_p9 = scmp.lt.u32.totalorder %s1033_s23, %s1357_s3 }
  0x18   :  { %p1039_p10 = pnand %p1037_p9, %p1034_p8 }
  0x1a   :  { %1042 = shalt.err (!%p1039_p10)
}
  0x1b   :  { %s1043_s29 = scalar_lea.vmem %s1209_s30, 2048  ;;  %p1048_p12 = scmp.lt.s32.totalorder %s1209_s30, %s1209_s30 }
  0x1c   :  { %p1044_p11 = scmp.ne.s32.totalorder %s1209_s30, %s1043_s29  ;;  %p1049_p13 = scmp.lt.s32.totalorder %s1043_s29, %s1043_s29 }
  0x1e   :  { %p1050_p0 = por %p1049_p13, %p1048_p12 }
  0x20   :  { %p1051_p1 = pnand %p1050_p0, %p1044_p11 }
  0x22   :  { %1054 = shalt.err (!%p1051_p1)
}
  0x23   :  { %s1155_s1 = smov 128   ;;  %s1156_s28 = smov 8  }
  0x24   :  { %64 = dma.hbm_to_vmem [thread:$0]  %s1357_s3, 2048, %s1209_s30, [#allocation9], %s1155_s1, %s1155_s1, %s1156_s28  }
  0x25   :  { %s1157_s11 = smov [#allocation2]   ;;  %s1158_s13 = smov [#allocation7]  }
  0x26   :  { %s22_s12 = sshll.u32 %s1157_s11, 4  ;;  %s46_s14 = sshll.u32 %s1158_s13, 4  ;;  %s23_s12 = int_to_ptr.vmem [resolvable:$true] %s22_s12  ;;  %s1246_s14 = int_to_ptr.vmem [resolvable:$true] %s46_s14 }
  0x27   :  { %s1055_s19 = scalar_lea.hbm %s1354_s0, 128 }
  0x28   :  { %p1056_p2 = scmp.ne.s32.totalorder %s1354_s0, %s1055_s19  ;;  %p1059_p3 = scmp.lt.u32.totalorder %s1055_s19, %s1354_s0 }
  0x2a   :  { %p1061_p4 = pnand %p1059_p3, %p1056_p2 }
  0x2c   :  { %1064 = shalt.err (!%p1061_p4)
}
  0x2d   :  { %s1065_s3 = scalar_lea.vmem %s23_s12, 128  ;;  %p1070_p6 = scmp.lt.s32.totalorder %s23_s12, %s23_s12 }
  0x2e   :  { %p1066_p5 = scmp.ne.s32.totalorder %s23_s12, %s1065_s3  ;;  %p1071_p7 = scmp.lt.s32.totalorder %s1065_s3, %s1065_s3 }
  0x30   :  { %p1072_p8 = por %p1071_p7, %p1070_p6 }
  0x32   :  { %p1073_p9 = pnand %p1072_p8, %p1066_p5 }
  0x34   :  { %1076 = shalt.err (!%p1073_p9)
}
  0x35   :  { %28 = dma.hbm_to_vmem [thread:$0]  %s1354_s0, 128, %s23_s12, [#allocation3], %s1153_s17, %s1153_s17, %s1154_s18  }
  0x36   :  { %s1077_s27 = scalar_lea.hbm %s1356_s2, 2048 }
  0x37   :  { %p1078_p10 = scmp.ne.s32.totalorder %s1356_s2, %s1077_s27  ;;  %p1081_p11 = scmp.lt.u32.totalorder %s1077_s27, %s1356_s2 }
  0x39   :  { %p1083_p12 = pnand %p1081_p11, %p1078_p10 }
  0x3b   :  { %1086 = shalt.err (!%p1083_p12)
}
  0x3c   :  { %s1087_s13 = scalar_lea.vmem %s1246_s14, 2048  ;;  %p1092_p0 = scmp.lt.s32.totalorder %s1246_s14, %s1246_s14 }
  0x3d   :  { %p1088_p13 = scmp.ne.s32.totalorder %s1246_s14, %s1087_s13  ;;  %p1093_p1 = scmp.lt.s32.totalorder %s1087_s13, %s1087_s13 }
  0x3f   :  { %p1094_p2 = por %p1093_p1, %p1092_p0 }
  0x41   :  { %p1095_p3 = pnand %p1094_p2, %p1088_p13 }
  0x43   :  { %1098 = shalt.err (!%p1095_p3)
}
  0x44   :  { %52 = dma.hbm_to_vmem [thread:$0]  %s1356_s2, 2048, %s1246_s14, [#allocation6], %s1153_s17, %s1153_s17, %s1154_s18  }
  0x45   :  { %s1159_s15 = smov [#allocation10]   ;;  %s1099_s21 = scalar_lea.hbm %s1358_s4, 2048 }
  0x46   :  { %s70_s16 = sshll.u32 %s1159_s15, 4  ;;  %p1100_p4 = scmp.ne.s32.totalorder %s1358_s4, %s1099_s21  ;;  %s71_s16 = int_to_ptr.vmem [resolvable:$true] %s70_s16 }
  0x47   :  { %p1103_p5 = scmp.lt.u32.totalorder %s1099_s21, %s1358_s4 }
  0x49   :  { %p1105_p6 = pnand %p1103_p5, %p1100_p4 }
  0x4b   :  { %1108 = shalt.err (!%p1105_p6)
}
  0x4c   :  { %s1109_s24 = scalar_lea.vmem %s71_s16, 2048  ;;  %p1114_p8 = scmp.lt.s32.totalorder %s71_s16, %s71_s16 }
  0x4d   :  { %p1110_p7 = scmp.ne.s32.totalorder %s71_s16, %s1109_s24  ;;  %p1115_p9 = scmp.lt.s32.totalorder %s1109_s24, %s1109_s24 }
  0x4f   :  { %p1116_p10 = por %p1115_p9, %p1114_p8 }
  0x51   :  { %p1117_p11 = pnand %p1116_p10, %p1110_p7 }
  0x53   :  { %1120 = shalt.err (!%p1117_p11)
}
  0x54   :  { %76 = dma.hbm_to_vmem [thread:$0]  %s1358_s4, 2048, %s71_s16, [#allocation9], %s1153_s17, %s1153_s17, %s1154_s18  }
  0x55   :  { %1143 = dma.done.wait [#allocation3], 128  }
  0x56   :  { %1144 = vsyncadd [#allocation3], 4294967168 }
  0x57   :  { %1145 = dma.done.wait [#allocation6], 2560  }
  0x58   :  { %1146 = vsyncadd [#allocation6], 4294964736 }
  0x59   :  { %1147 = dma.done.wait [#allocation9], 4096  }
  0x5a   :  { %1148 = vsyncadd [#allocation9], 4294963200  ;;  %v1160_v0 = vmov 0.0   ;;  %vm1161_vm0 = vmmov 0   ;;  %v950_v1 = vld [vmem:[#allocation5] sm:$0xff]   ;;  %v951_v2 = vld [vmem:[#allocation5 + $0x8] sm:$0xff]  }
  0x5b   :  { %885 = vmatprep.subr.bf16.mxu0 %v1160_v0  ;;  %893 = vmatprep.mubr.msk.bf16.mxu0 %vm1161_vm0, %v1160_v0  ;;  %v955_v3 = vld [vmem:[#allocation7] sm:$0xff]   ;;  %v952_v4 = vld [vmem:[#allocation5 + $0x10] sm:$0xff]   ;;  %v956_v5 = vld [vmem:[#allocation7 + $0x8] sm:$0xff]   ;;  %vm145_vm1 = vcmask 523264   ;;  %v1162_v58 = vmov 0   ;;  %s1163_s10 = smov [#allocation11]  }
  0x5c   :  { %897 = vmatprep.subr.bf16.mxu1 %v1160_v0  ;;  %913 = vmatprep.mubr.msk.bf16.mxu1 %vm1161_vm0, %v1160_v0  ;;  %v953_v6 = vld [vmem:[#allocation5 + $0x18] sm:$0xff]   ;;  %v957_v8 = vld [vmem:[#allocation7 + $0x10] sm:$0xff]   ;;  %v959_v10 = vld [vmem:[#allocation7 + $0x20] sm:$0xff]   ;;  %s766_s11 = sshll.u32 %s1163_s10, 4  ;;  %s767_s11 = int_to_ptr.vmem [resolvable:$true] %s766_s11 }
  0x5d   :  { %886 = vmatpush3.bf16.msra.mxu0 %v950_v1  ;;  %898 = vmatpush3.bf16.msra.mxu1 %v955_v3  ;;  %v954_v7 = vld [vmem:[#allocation2] sm:$0xff]   ;;  %v960_v11 = vld [vmem:[#allocation7 + $0x28] sm:$0xff]   ;;  %v961_v12 = vld [vmem:[#allocation7 + $0x30] sm:$0xff]   ;;  %s1121_s13 = scalar_lea.vmem %s767_s11, 256  ;;  %p1126_p13 = scmp.lt.s32.totalorder %s767_s11, %s767_s11 }
  0x5e   :  { %887 = vmatprep.subr.bf16.mxu0 %v1160_v0  ;;  %899 = vmatprep.subr.bf16.mxu1 %v1160_v0  ;;  %v958_v9 = vld [vmem:[#allocation7 + $0x18] sm:$0xff]   ;;  %v963_v14 = vld [vmem:[#allocation7 + $0x40] sm:$0xff]   ;;  %v964_v15 = vld [vmem:[#allocation7 + $0x48] sm:$0xff]   ;;  %p1122_p12 = scmp.ne.s32.totalorder %s767_s11, %s1121_s13  ;;  %p1127_p0 = scmp.lt.s32.totalorder %s1121_s13, %s1121_s13 }
  0x5f   :  { %v962_v13 = vld [vmem:[#allocation7 + $0x38] sm:$0xff]   ;;  %v965_v16 = vld [vmem:[#allocation7 + $0x50] sm:$0xff]   ;;  %v967_v18 = vld [vmem:[#allocation7 + $0x60] sm:$0xff]  }
  0x60   :  { %v966_v17 = vld [vmem:[#allocation7 + $0x58] sm:$0xff]   ;;  %v968_v19 = vld [vmem:[#allocation7 + $0x68] sm:$0xff]   ;;  %v969_v30 = vld [vmem:[#allocation7 + $0x70] sm:$0xff]   ;;  %p1128_p1 = por %p1127_p0, %p1126_p13 }
  0x61   :  { %888 = vmatpush3.bf16.msra.mxu0 %v951_v2  ;;  %900 = vmatpush3.bf16.msra.mxu1 %v956_v5  ;;  %v780_v20 = vld [vmem:[%s1359_s5] ss:$0 sm:$0xff]  ;;  %v971_v32 = vld [vmem:[#allocation8] ss:$8 sps:$4 sm:$0xff]   ;;  %v973_v33 = vld [vmem:[#allocation8 + $0x4] ss:$8 sps:$4 sm:$0xff]  }
  0x62   :  { %889 = vmatprep.subr.bf16.mxu0 %v1160_v0  ;;  %901 = vmatprep.subr.bf16.mxu1 %v1160_v0  ;;  %v970_v31 = vld [vmem:[#allocation7 + $0x78] sm:$0xff]   ;;  %v979_v36 = vld [vmem:[#allocation8 + $0x24] ss:$8 sps:$4 sm:$0xff]   ;;  %v977_v37 = vld [vmem:[#allocation8 + $0x20] ss:$8 sps:$4 sm:$0xff]   ;;  %p1129_p2 = pnand %p1128_p1, %p1122_p12 }
  0x63   :  { %v976_v34 = vld [vmem:[#allocation8 + $0x14] ss:$8 sps:$4 sm:$0xff]   ;;  %v974_v35 = vld [vmem:[#allocation8 + $0x10] ss:$8 sps:$4 sm:$0xff]   ;;  %v985_v40 = vld [vmem:[#allocation8 + $0x44] ss:$8 sps:$4 sm:$0xff]  }
  0x64   :  { %v982_v38 = vld [vmem:[#allocation8 + $0x34] ss:$8 sps:$4 sm:$0xff]   ;;  %v980_v39 = vld [vmem:[#allocation8 + $0x30] ss:$8 sps:$4 sm:$0xff]   ;;  %v983_v41 = vld [vmem:[#allocation8 + $0x40] ss:$8 sps:$4 sm:$0xff]  }
  0x65   :  { %890 = vmatpush3.bf16.msra.mxu0 %v952_v4  ;;  %902 = vmatpush3.bf16.msra.mxu1 %v957_v8  ;;  %v988_v42 = vld [vmem:[#allocation8 + $0x54] ss:$8 sps:$4 sm:$0xff]   ;;  %v986_v43 = vld [vmem:[#allocation8 + $0x50] ss:$8 sps:$4 sm:$0xff]   ;;  %v991_v54 = vld [vmem:[#allocation8 + $0x64] ss:$8 sps:$4 sm:$0xff]  }
  0x66   :  { %891 = vmatprep.subr.bf16.mxu0 %v1160_v0  ;;  %903 = vmatprep.subr.bf16.mxu1 %v1160_v0  ;;  %v788_v44 = vld [vmem:[%s1359_s5 + $0x1] ss:$0 sm:$0xff]  ;;  %v989_v55 = vld [vmem:[#allocation8 + $0x60] ss:$8 sps:$4 sm:$0xff]   ;;  %v994_v56 = vld [vmem:[#allocation8 + $0x74] ss:$8 sps:$4 sm:$0xff]  }
  0x67   :  { %v992_v57 = vld [vmem:[#allocation8 + $0x70] ss:$8 sps:$4 sm:$0xff]   ;;  %v995_v59 = vld [vmem:[#allocation10 + $0x40] sm:$0xff]   ;;  %v997_v61 = vld [vmem:[#allocation10 + $0x48] sm:$0xff]  }
  0x68   :  { %v996_v60 = vld [vmem:[#allocation10] sm:$0xff]   ;;  %v998_v62 = vld [vmem:[#allocation10 + $0x8] sm:$0xff]   ;;  %v999_v63 = vld [vmem:[#allocation10 + $0x50] sm:$0xff]  }
  0x69   :  { %892 = vmatpush3.bf16.msra.mxu0 %v953_v6  ;;  %904 = vmatpush3.bf16.msra.mxu1 %v958_v9  ;;  %v1001_v1 = vld [vmem:[#allocation10 + $0x58] sm:$0xff]   ;;  %v1003_v3 = vld [vmem:[#allocation10 + $0x60] sm:$0xff]   ;;  %v1005_v5 = vld [vmem:[#allocation10 + $0x68] sm:$0xff]  }
  0x6a   :  { %917 = vmatprep.subr.bf16.mxu0 %v1160_v0  ;;  %905 = vmatprep.subr.bf16.mxu1 %v1160_v0  ;;  %v1002_v2 = vld [vmem:[#allocation10 + $0x18] sm:$0xff]   ;;  %v1004_v4 = vld [vmem:[#allocation10 + $0x20] sm:$0xff]  }
  0x6b   :  { %v798_v6 = vld [vmem:[%s1359_s5 + $0x2] ss:$0 sm:$0xff] }
  0x6c   :  { %894 = vmatmul.mubr.msk.bf16.vlgmr.msra.gmra.mrb[0].mxu0 %vm145_vm1, %v954_v7 }
  0x6d   :  { %933 = vmatprep.mubr.msk.bf16.mxu0 %vm1161_vm0, %v1160_v0  ;;  %906 = vmatpush3.bf16.msra.mxu1 %v959_v10 }
  0x6e   :  { %907 = vmatprep.subr.bf16.mxu1 %v1160_v0  ;;  %918 = vmatpush3.bf16.msra.mxu0 %v963_v14 }
  0x6f   :  { %919 = vmatprep.subr.bf16.mxu0 %v1160_v0 }
  0x71   :  { %908 = vmatpush3.bf16.msra.mxu1 %v960_v11 }
  0x72   :  { %909 = vmatprep.subr.bf16.mxu1 %v1160_v0  ;;  %920 = vmatpush3.bf16.msra.mxu0 %v964_v15 }
  0x73   :  { %921 = vmatprep.subr.bf16.mxu0 %v1160_v0 }
  0x75   :  { %910 = vmatpush3.bf16.msra.mxu1 %v961_v12 }
  0x76   :  { %911 = vmatprep.subr.bf16.mxu1 %v1160_v0  ;;  %922 = vmatpush3.bf16.msra.mxu0 %v965_v16  ;;  %v1006_v16 = vld [vmem:[#allocation10 + $0x28] sm:$0xff]  }
  0x77   :  { %923 = vmatprep.subr.bf16.mxu0 %v1160_v0 }
  0x79   :  { %912 = vmatpush3.bf16.msra.mxu1 %v962_v13 }
  0x7a   :  { %924 = vmatpush3.bf16.msra.mxu0 %v966_v17  ;;  %534 = vmatprep.subr.bf16.mxu1 %v973_v33  ;;  %v1007_v17 = vld [vmem:[#allocation10 + $0x70] sm:$0xff]  }
  0x7b   :  { %925 = vmatprep.subr.bf16.mxu0 %v1160_v0 }
  0x7e   :  { %926 = vmatpush3.bf16.msra.mxu0 %v967_v18  ;;  %v1008_v18 = vld [vmem:[#allocation10 + $0x30] sm:$0xff]  }
  0x7f   :  { %927 = vmatprep.subr.bf16.mxu0 %v1160_v0 }
  0x82   :  { %928 = vmatpush3.bf16.msra.mxu0 %v968_v19  ;;  %v1009_v19 = vld [vmem:[#allocation10 + $0x78] sm:$0xff]  }
  0x83   :  { %929 = vmatprep.subr.bf16.mxu0 %v1160_v0 }
  0x86   :  { %930 = vmatpush3.bf16.msra.mxu0 %v969_v30 }
  0x87   :  { %931 = vmatprep.subr.bf16.mxu0 %v1160_v0  ;;  %v1000_v0 = vld [vmem:[#allocation10 + $0x10] sm:$0xff]  }
  0x8a   :  { %932 = vmatpush3.bf16.msra.mxu0 %v970_v31 }
  0x8b   :  { %863 = vmatprep.subr.bf16.mxu0 %v995_v59 }
 0x13f   :  { %v183_v21 = vpop.f32.mrb[0].mxu0 }
 0x140   :  { %v184_v22 = vadd.f32 %v780_v20, %v183_v21  ;;  %v895_v23 = vpop.f32.mrb[1].mxu0  ;;  %v444_v21 = vlaneseq }
 0x141   :  { %v186_v24 = vpop.f32.mrb[2].mxu0 }
 0x142   :  { %v187_v25 = vadd.f32 %v780_v20, %v186_v24  ;;  %v896_v26 = vpop.f32.mrb[3].mxu0  ;;  %v190_v27 = vmax.f32 %v184_v22, 0.0  ;;  %v1010_v20 = vld [vmem:[#allocation10 + $0x38] sm:$0xff]   ;;  %v445_v22 = vshrl.u32 %v444_v21, 7 }
 0x143   :  { %v442_v24 = vld [vmem:[%s1360_s6] sm:$0x3] }
 0x144   :  { %v191_v28 = vmax.f32 %v187_v25, 0.0  ;;  %v446_v23 = vsub.s32 0, %v445_v22  ;;  %v450_v25 = vsub.s32 1, %v445_v22 }
 0x146   :  { %v192_v29 = vpack.c.bf16 %v191_v28, %v190_v27  ;;  %v447_v26 = vrot.slane %v442_v24, %v446_v23  ;;  %v451_v27 = vrot.slane %v442_v24, %v450_v25 }
 0x148   :  { %914 = vmatmul.mubr.bf16.vlgmr.msra.gmra.mrb[0].mxu1 %v192_v29 }
 0x149   :  { %535 = vmatpush1.bf16.msra.mxu1 %v971_v32  ;;  %566 = vmatprep.mubr.bf16.mxu1 %v1162_v58 }
 0x14a   :  { %536 = vmatprep.subr.bf16.mxu1 %v976_v34 }
 0x14d   :  { %537 = vmatpush1.bf16.msra.mxu1 %v974_v35 }
 0x14e   :  { %538 = vmatprep.subr.bf16.mxu1 %v979_v36 }
 0x151   :  { %539 = vmatpush1.bf16.msra.mxu1 %v977_v37 }
 0x152   :  { %540 = vmatprep.subr.bf16.mxu1 %v982_v38 }
 0x155   :  { %541 = vmatpush1.bf16.msra.mxu1 %v980_v39 }
 0x156   :  { %542 = vmatprep.subr.bf16.mxu1 %v985_v40 }
 0x159   :  { %543 = vmatpush1.bf16.msra.mxu1 %v983_v41 }
 0x15a   :  { %544 = vmatprep.subr.bf16.mxu1 %v988_v42 }
 0x15d   :  { %545 = vmatpush1.bf16.msra.mxu1 %v986_v43  ;;  %v823_v43 = vld [vmem:[%s1361_s7] ss:$0 sm:$0xff] }
 0x15e   :  { %546 = vmatprep.subr.bf16.mxu1 %v991_v54 }
 0x161   :  { %547 = vmatpush1.bf16.msra.mxu1 %v989_v55 }
 0x162   :  { %548 = vmatprep.subr.bf16.mxu1 %v994_v56 }
 0x165   :  { %549 = vmatpush1.bf16.msra.mxu1 %v992_v57 }
 0x21b   :  { %v299_v45 = vpop.f32.mrb[0].mxu1 }
 0x21c   :  { %v300_v46 = vadd.f32 %v788_v44, %v299_v45  ;;  %v915_v47 = vpop.f32.mrb[1].mxu1 }
 0x21d   :  { %v302_v48 = vpop.f32.mrb[2].mxu1 }
 0x21e   :  { %v303_v49 = vadd.f32 %v788_v44, %v302_v48  ;;  %v916_v50 = vpop.f32.mrb[3].mxu1  ;;  %v306_v51 = vmax.f32 %v300_v46, 0.0 }
 0x220   :  { %v307_v52 = vmax.f32 %v303_v49, 0.0 }
 0x222   :  { %v308_v53 = vpack.c.bf16 %v307_v52, %v306_v51 }
 0x224   :  { %934 = vmatmul.mubr.bf16.vlgmr.msra.gmra.mrb[4].mxu0 %v308_v53 }
 0x225   :  { %864 = vmatpush3.bf16.msra.mxu0 %v996_v60 }
 0x226   :  { %865 = vmatprep.subr.bf16.mxu0 %v997_v61 }
 0x229   :  { %866 = vmatpush3.bf16.msra.mxu0 %v998_v62 }
 0x22a   :  { %867 = vmatprep.subr.bf16.mxu0 %v999_v63 }
 0x22d   :  { %868 = vmatpush3.bf16.msra.mxu0 %v1000_v0 }
 0x22e   :  { %869 = vmatprep.subr.bf16.mxu0 %v1001_v1 }
 0x231   :  { %870 = vmatpush3.bf16.msra.mxu0 %v1002_v2 }
 0x232   :  { %871 = vmatprep.subr.bf16.mxu0 %v1003_v3 }
 0x235   :  { %872 = vmatpush3.bf16.msra.mxu0 %v1004_v4 }
 0x236   :  { %873 = vmatprep.subr.bf16.mxu0 %v1005_v5 }
 0x239   :  { %874 = vmatpush3.bf16.msra.mxu0 %v1006_v16 }
 0x23a   :  { %875 = vmatprep.subr.bf16.mxu0 %v1007_v17 }
 0x23d   :  { %876 = vmatpush3.bf16.msra.mxu0 %v1008_v18 }
 0x23e   :  { %877 = vmatprep.subr.bf16.mxu0 %v1009_v19 }
 0x241   :  { %878 = vmatpush3.bf16.msra.mxu0 %v1010_v20 }
 0x2f7   :  { %v416_v7 = vpop.f32.mrb[4].mxu0 }
 0x2f8   :  { %v417_v8 = vadd.f32 %v798_v6, %v416_v7  ;;  %v935_v9 = vpop.f32.mrb[5].mxu0 }
 0x2f9   :  { %v419_v10 = vpop.f32.mrb[6].mxu0 }
 0x2fa   :  { %v420_v11 = vadd.f32 %v798_v6, %v419_v10  ;;  %v936_v12 = vpop.f32.mrb[7].mxu0  ;;  %v423_v13 = vmax.f32 %v417_v8, 0.0 }
 0x2fc   :  { %v424_v14 = vmax.f32 %v420_v11, 0.0 }
 0x2fe   :  { %v425_v15 = vpack.c.bf16 %v424_v14, %v423_v13 }
 0x300   :  { %567 = vmatmul.mubr.bf16.vlgmr.msra.gmra.mrb[4].mxu1 %v425_v15 }
 0x3d3   :  { %v568_v28 = vpop.f32.mrb[4].mxu1 }
 0x3d4   :  { %v569_v29 = vadd.f32 %v568_v28, %v447_v26  ;;  %v570_v30 = vpop.f32.mrb[5].mxu1 }
 0x3d5   :  { %v571_v31 = vadd.f32 %v570_v30, %v451_v27  ;;  %v572_v32 = vpop.f32.mrb[6].mxu1 }
 0x3d6   :  { %v573_v33 = vadd.f32 %v572_v32, %v447_v26  ;;  %v574_v34 = vpop.f32.mrb[7].mxu1  ;;  %v577_v36 = vmax.f32 %v569_v29, 0.0 }
 0x3d7   :  { %v575_v35 = vadd.f32 %v574_v34, %v451_v27  ;;  %v578_v38 = vmax.f32 %v571_v31, 0.0 }
 0x3d8   :  { %v579_v37 = vmax.f32 %v573_v33, 0.0 }
 0x3d9   :  { %v580_v39 = vmax.f32 %v575_v35, 0.0 }
 0x3da   :  { %v581_v40 = vpack.c.bf16 %v579_v37, %v577_v36 }
 0x3db   :  { %v582_v41 = vpack.c.bf16 %v580_v39, %v578_v38 }
 0x3dd   :  { %750 = vmatprep.mubr.bf16.mxu0 %v582_v41 }
 0x3de   :  { %751 = vmatmul.mubr.bf16.vlgmr.msra.gmra.mrb[8].mxu0 %v581_v40 }
 0x4b1   :  { %v879_v42 = vpop.f32.mrb[8].mxu0 }
 0x4b2   :  { %v880_v44 = vpop.f32.mrb[9].mxu0 }
 0x4b3   :  { %v881_v45 = vadd.f32 %v880_v44, %v879_v42  ;;  %v882_v46 = vpop.f32.mrb[10].mxu0 }
 0x4b4   :  { %v883_v47 = vpop.f32.mrb[11].mxu0 }
 0x4b5   :  { %v753_v48 = vadd.f32 %v881_v45, %v823_v43  ;;  %v884_v49 = vadd.f32 %v883_v47, %v882_v46 }
 0x4b7   :  { %759 = vst [vmem:[#allocation11] sm:$0xff] %v753_v48  ;;  %v756_v50 = vadd.f32 %v884_v49, %v823_v43 }
 0x4b9   :  { %760 = vst [vmem:[#allocation11 + $0x8] sm:$0xff] %v756_v50 }
 0x4ba   :  { %1132 = shalt.err (!%p1129_p2)
}
 0x4bb   :  { %s1133_s12 = scalar_lea.hbm %s1362_s8, 256 }
 0x4bc   :  { %p1134_p3 = scmp.ne.s32.totalorder %s1362_s8, %s1133_s12  ;;  %p1137_p4 = scmp.lt.u32.totalorder %s1133_s12, %s1362_s8 }
 0x4be   :  { %p1139_p5 = pnand %p1137_p4, %p1134_p3 }
 0x4c0   :  { %1142 = shalt.err (!%p1139_p5)
}
 0x4c1   :  { %772 = dma.vmem_to_hbm [thread:$0]  %s767_s11, 256, %s1362_s8, [#allocation4], %s1155_s1, %s1155_s1, %s1156_s28  }
 0x4c2   :  { %1149 = dma.done.wait [#allocation4], 256  }
 0x4c3   :  { %1150 = vsyncadd [#allocation4], 4294967040 }
 0x4c4   :  { %776 = vsyncpa [#allocation3], 1 }
 0x4c5   :  { %777 = vsyncpa [#allocation6], 1 }
 0x4c6   :  { %778 = vsyncpa [#allocation9], 1 }
 0x4c7   :  { %779 = vsyncpa [#allocation4], 1 }

</bundles_post_ra>
